<compile_context>
chip_gen: v6e
topology: v6e:2x2x1
jax: 0.10.0
libtpu: 0.0.40
codegen_flags: <defaults>
</compile_context>

<pallas_src>
import functools

import jax
import jax.numpy as jnp
from jax import lax
from jax.experimental import pallas as pl
from jax.experimental.pallas import tpu as pltpu


# ----------------------------------------------------------------------------
# Pallas kernel: 3x3 same-padded conv for Nb images, NCHW layout with H*W
# flattened on the lane axis.
# ----------------------------------------------------------------------------
def _conv3x3_kernel(x_ref, w_ref, b_ref, o_ref, lhs_ref, *, H, W, C, Cp, Nb):
    # x_ref  : (Nb, C, H*W)      images, spatial on the lane axis
    # w_ref  : (Cout, 9*Cp)      resident packed taps (channels padded to Cp)
    # b_ref  : (Cout, 1)         resident bias
    # o_ref  : (Nb, Cout, H*W)   lane-dense output block
    # lhs_ref: (9*Cp, Nb*H*W)    im2col RHS scratch -> one MXU matmul per step
    HW = H * W

    x = x_ref[...]                                           # (Nb, C, HW)
    if Cp != C:
        # Zero-pad the channel (sublane) axis so every tap block is a full,
        # aligned Cp-row write; padded rows stay exactly zero (their weight
        # columns are zero too), so no persistent-scratch init is needed.
        x = jnp.concatenate(
            [x, jnp.zeros((Nb, Cp - C, HW), x.dtype)], axis=1)  # (Nb, Cp, HW)

    # Border-validity masks on the flattened row-major spatial axis, computed
    # once per grid step.  Row masks need no integer division.
    pos = lax.broadcasted_iota(jnp.int32, (1, HW), 1)
    col = pos % W
    col_mask = {-1: col > 0, 0: None, 1: col < (W - 1)}          # dx = -1 / +1
    row_mask = {-1: pos >= W, 0: None, 1: pos < (H - 1) * W}     # dy = -1 / +1

    # Build the im2col RHS: tap t = ky*3+kx occupies sublane-aligned rows
    # [t*Cp, (t+1)*Cp); image n occupies lane columns [n*HW, (n+1)*HW).
    for n in range(Nb):
        xn = x[n]                                            # (Cp, HW)
        for ky in range(3):
            for kx in range(3):
                dy, dx = ky - 1, kx - 1
                t = ky * 3 + kx
                # Want piece[p] = xn[p + dy*W + dx] (np.roll semantics), with
                # the wrap-around positions killed by the border masks.
                shift = (-(dy * W + dx)) % HW
                piece = xn if shift == 0 else pltpu.roll(xn, shift, axis=1)
                m = row_mask[dy]
                if col_mask[dx] is not None:
                    m = (col_mask[dx] if m is None
                         else jnp.logical_and(m, col_mask[dx]))
                if m is not None:
                    piece = jnp.where(m, piece, jnp.zeros_like(piece))
                lhs_ref[t * Cp:(t + 1) * Cp, n * HW:(n + 1) * HW] = piece

    # Single MXU contraction over all taps*channels for all Nb images.
    # M = Cout is tiny, so the matmul is push/drain-bound, not FLOP-bound: the
    # real levers are store traffic and per-step overhead (hence roll-based
    # taps + Nb batching), not matmul tuning.
    acc = jnp.dot(w_ref[...], lhs_ref[...],
                  preferred_element_type=jnp.float32)        # (Cout, Nb*HW)
    acc = acc + b_ref[...]                                   # broadcast on lanes
    # TODO(synk): optionally fold the bias into the matmul (ones row in lhs,
    # bias column in w_packed) to drop this operand and the broadcast add.
    for n in range(Nb):
        o_ref[n] = acc[:, n * HW:(n + 1) * HW].astype(o_ref.dtype)


# ----------------------------------------------------------------------------
# One-time parameter packing (hoisted out of the per-call path).
# ----------------------------------------------------------------------------
def pack_conv3x3_params(w_oihw, b):
    """Pack Conv2d(C->Cout, 3, padding=1) params once: w_packed[o, t*Cp+c]."""
    Cout, C, kh, kw = w_oihw.shape
    assert (kh, kw) == (3, 3)
    itemsize = jnp.dtype(w_oihw.dtype).itemsize
    sub = 8 * (4 // itemsize)      # sublane tile rows: 8 f32 / 16 bf16 / 32 i8
    Cp = ((C + sub - 1) // sub) * sub
    w_t = jnp.transpose(w_oihw, (0, 2, 3, 1)).reshape(Cout, 9, C)
    w_packed = (jnp.zeros((Cout, 9, Cp), w_oihw.dtype)
                .at[:, :, :C].set(w_t)
                .reshape(Cout, 9 * Cp))
    bias = b.reshape(Cout, 1).astype(jnp.float32)
    return {"w_packed": w_packed, "bias": bias, "C": C, "Cp": Cp, "Cout": Cout}


def _pick_batch_block(N, HW, K, itemsize, lhs_budget_bytes=6 << 20, max_nb=8):
    """Largest Nb dividing N s.t. the im2col scratch fits the budget and (for
    N >= 2) at least two grid steps remain so v7x's second TC gets work."""
    nb = 1
    for cand in range(1, min(N, max_nb) + 1):
        if N % cand:
            continue
        if K * cand * HW * itemsize > lhs_budget_bytes:
            continue
        if N >= 2 and N // cand < 2:
            continue
        nb = cand
    return nb


# ----------------------------------------------------------------------------
# self.layer: Conv2d(C, Cout, 3, padding=1), NCHW in / NCHW out.
# ----------------------------------------------------------------------------
def _layer_conv3x3(t_nchw, packed):
    N, C, H, W = t_nchw.shape
    assert C == packed["C"]
    Cout, Cp = packed["Cout"], packed["Cp"]
    HW = H * W
    K = 9 * Cp
    dt = t_nchw.dtype
    assert dt == packed["w_packed"].dtype

    # Free layout change only (reshape of the minor dims): no transpose, no pad.
    x = t_nchw.reshape(N, C, HW)

    Nb = _pick_batch_block(N, HW, K, jnp.dtype(dt).itemsize)
    grid = (N // Nb,)

    kernel = functools.partial(_conv3x3_kernel, H=H, W=W, C=C, Cp=Cp, Nb=Nb)

    # TODO(synk): for large H*W add an H-strip grid axis with a 1-row halo so
    # the (9*Cp, Nb*HW) im2col scratch stays ~4-8 MiB on v7x (64 MiB VMEM) and
    # set CompilerParams(vmem_limit_bytes=...) explicitly; on v7x also consider
    # 9 accumulating dots (MRB in-place accumulate) instead of materialising
    # the im2col RHS.
    out = pl.pallas_call(
        kernel,
        out_shape=jax.ShapeDtypeStruct((N, Cout, HW), dt),
        grid_spec=pltpu.PrefetchScalarGridSpec(
            num_scalar_prefetch=0,
            grid=grid,
            in_specs=[
                pl.BlockSpec((Nb, C, HW), lambda i: (i, 0, 0)),
                pl.BlockSpec((Cout, K), lambda i: (0, 0)),    # resident weights
                pl.BlockSpec((Cout, 1), lambda i: (0, 0)),    # resident bias
            ],
            out_specs=pl.BlockSpec((Nb, Cout, HW), lambda i: (i, 0, 0)),
            scratch_shapes=[
                pltpu.VMEM((K, Nb * HW), dt),                 # im2col RHS
            ],
        ),
        compiler_params=pltpu.CompilerParams(
            dimension_semantics=("parallel",)),
    )(x, packed["w_packed"], packed["bias"])

    return out.reshape(N, Cout, H, W)   # free reshape back to NCHW


# ----------------------------------------------------------------------------
# DDOpBase.forward
# ----------------------------------------------------------------------------
def dd_op_base_forward(t, packed_layer_params, *, domain_size_x, domain_size_y,
                       subdomain_size_x, subdomain_size_y, overlap,
                       use_coarse_op=False):
    assert t.ndim == 4, "DDOpBase.forward expects a 4D (N, C, H, W) tensor"
    if (subdomain_size_x == domain_size_x
            and subdomain_size_y == domain_size_y):
        # forward() fast path: return self.layer(t)
        return _layer_conv3x3(t, packed_layer_params)
    # TODO(synk): subdomain path needs get_subdomain_indices, the abstract
    # _apply_op (NotImplementedError in DDOpBase), and CoarseOpCNN/MLP, none of
    # which are defined in the reference module — not faking them here.
    raise NotImplementedError(
        "DDOpBase._apply_op is abstract; only the full-domain branch is "
        "implemented.")


# ----------------------------------------------------------------------------
# Demo / self-check
# ----------------------------------------------------------------------------
if __name__ == "__main__":
    key = jax.random.PRNGKey(0)
    k_t, k_w, k_b = jax.random.split(key, 3)

    N, C, H, W = 4, 4, 16, 16     # N=4 -> Nb=2 images per grid step, 2 steps
    hc = 8                        # out channels of the wrapped layer

    t = jax.random.normal(k_t, (N, C, H, W), jnp.float32)
    # Deterministic synthetic params for self.layer = Conv2d(C, hc, 3, pad=1)
    w_oihw = 0.1 * jax.random.normal(k_w, (hc, C, 3, 3), jnp.float32)
    b = 0.1 * jax.random.normal(k_b, (hc,), jnp.float32)

    packed = pack_conv3x3_params(w_oihw, b)   # hoisted: pack once, not per call

    out = dd_op_base_forward(
        t, packed,
        domain_size_x=1.0, domain_size_y=1.0,
        subdomain_size_x=1.0, subdomain_size_y=1.0,   # == domain -> layer(t)
        overlap=0.1, use_coarse_op=False)
    out = jax.block_until_ready(out)

    # Pure-JAX reference of the same conv for a correctness check.
    ref = lax.conv_general_dilated(
        t, w_oihw, window_strides=(1, 1), padding=[(1, 1), (1, 1)],
        dimension_numbers=("NCHW", "OIHW", "NCHW")) + b[None, :, None, None]

    assert out.shape == (N, hc, H, W), out.shape
    err = float(jnp.max(jnp.abs(out - ref)))
    assert jnp.allclose(out, ref, atol=1e-4, rtol=1e-4), err

    print("KERNEL_OK")
</pallas_src>

<mosaic_0001>
module attributes {stable_mosaic.version = 11 : i64} {
  func.func @_conv3x3_kernel(%arg0: i32, %arg1: memref<2x4x256xf32, #tpu.memory_space<vmem>>, %arg2: memref<8x72xf32, #tpu.memory_space<vmem>>, %arg3: memref<8x1xf32, #tpu.memory_space<vmem>>, %arg4: memref<2x8x256xf32, #tpu.memory_space<vmem>>, %arg5: memref<72x512xf32, #tpu.memory_space<vmem>>) attributes {dimension_semantics = [#tpu.dimension_semantics<parallel>], iteration_bounds = array<i64: 2>, scalar_prefetch = 0 : i64, scratch_operands = 1 : i64, tpu.core_type = #tpu.core_type<tc>, window_params = [{transform_indices = @transform_0, window_bounds = array<i64: 2, 4, 256>}, {pipeline_mode = #tpu.pipeline_mode<synchronous>, transform_indices = @transform_1, window_bounds = array<i64: 8, 72>}, {pipeline_mode = #tpu.pipeline_mode<synchronous>, transform_indices = @transform_2, window_bounds = array<i64: 8, 1>}, {transform_indices = @transform_3, window_bounds = array<i64: 2, 8, 256>}]} {
    %c0 = arith.constant 0 : index
    %c0_0 = arith.constant 0 : index
    %c0_1 = arith.constant 0 : index
    %0 = vector.load %arg1[%c0, %c0_0, %c0_1] : memref<2x4x256xf32, #tpu.memory_space<vmem>>, vector<2x4x256xf32>
    %cst = arith.constant 0.000000e+00 : f32
    %1 = vector.broadcast %cst : f32 to vector<2x4x256xf32>
    %2 = tpu.concatenate %0, %1 in 1 : vector<2x4x256xf32>, vector<2x4x256xf32> -> vector<2x8x256xf32>
    %3 = tpu.iota {dimensions = array<i32: 1>} : vector<1x256xi32>
    %c16_i32 = arith.constant 16 : i32
    %c0_i32 = arith.constant 0 : i32
    %4 = arith.cmpi eq, %c16_i32, %c0_i32 : i32
    %c1_i32 = arith.constant 1 : i32
    %5 = arith.select %4, %c1_i32, %c16_i32 : i32
    %6 = vector.broadcast %5 : i32 to vector<1x256xi32>
    %7 = arith.remsi %3, %6 : vector<1x256xi32>
    %c0_i32_2 = arith.constant 0 : i32
    %8 = vector.broadcast %c0_i32_2 : i32 to vector<1x256xi32>
    %9 = arith.cmpi ne, %7, %8 : vector<1x256xi32>
    %c0_i32_3 = arith.constant 0 : i32
    %10 = vector.broadcast %c0_i32_3 : i32 to vector<1x256xi32>
    %11 = arith.cmpi slt, %7, %10 : vector<1x256xi32>
    %c0_i32_4 = arith.constant 0 : i32
    %12 = arith.cmpi slt, %5, %c0_i32_4 : i32
    %13 = vector.broadcast %12 : i1 to vector<1x256xi1>
    %14 = vector.broadcast %13 : vector<1x256xi1> to vector<1x256xi1>
    %15 = arith.xori %11, %14 : vector<1x256xi1>
    %16 = arith.andi %15, %9 : vector<1x256xi1>
    %17 = vector.broadcast %5 : i32 to vector<1x256xi32>
    %18 = arith.addi %7, %17 : vector<1x256xi32>
    %19 = arith.select %16, %18, %7 : vector<1x256xi1>, vector<1x256xi32>
    %c0_i32_5 = arith.constant 0 : i32
    %20 = vector.broadcast %c0_i32_5 : i32 to vector<1x256xi32>
    %21 = arith.cmpi sgt, %19, %20 : vector<1x256xi32>
    %c15_i32 = arith.constant 15 : i32
    %22 = vector.broadcast %c15_i32 : i32 to vector<1x256xi32>
    %23 = arith.cmpi slt, %19, %22 : vector<1x256xi32>
    %c16_i32_6 = arith.constant 16 : i32
    %24 = vector.broadcast %c16_i32_6 : i32 to vector<1x256xi32>
    %25 = arith.cmpi sge, %3, %24 : vector<1x256xi32>
    %c240_i32 = arith.constant 240 : i32
    %26 = vector.broadcast %c240_i32 : i32 to vector<1x256xi32>
    %27 = arith.cmpi slt, %3, %26 : vector<1x256xi32>
    %28 = vector.extract_strided_slice %2 {offsets = [0, 0, 0], sizes = [1, 8, 256], strides = [1, 1, 1]} : vector<2x8x256xf32> to vector<1x8x256xf32>
    %29 = vector.shape_cast %28 : vector<1x8x256xf32> to vector<8x256xf32>
    %c17_i32 = arith.constant 17 : i32
    %30 = tpu.dynamic_rotate %29 by %c17_i32 dim 1 : vector<8x256xf32>, i32 -> vector<8x256xf32>
    %31 = arith.andi %25, %21 : vector<1x256xi1>
    %cst_7 = arith.constant 0.000000e+00 : f32
    %32 = vector.broadcast %cst_7 : f32 to vector<8x256xf32>
    %33 = vector.shape_cast %31 : vector<1x256xi1> to vector<1x256xi1>
    %34 = vector.broadcast %33 : vector<1x256xi1> to vector<8x256xi1>
    %35 = arith.select %34, %30, %32 : vector<8x256xi1>, vector<8x256xf32>
    %c0_8 = arith.constant 0 : index
    %c0_9 = arith.constant 0 : index
    %36 = vector.load %arg5[%c0_8, %c0_9] : memref<72x512xf32, #tpu.memory_space<vmem>>, vector<8x256xf32>
    tpu.vector_store %arg5[%c0_8, %c0_9], %35 {strides = array<i32>} : memref<72x512xf32, #tpu.memory_space<vmem>>, vector<8x256xf32>,
    %c16_i32_10 = arith.constant 16 : i32
    %37 = tpu.dynamic_rotate %29 by %c16_i32_10 dim 1 : vector<8x256xf32>, i32 -> vector<8x256xf32>
    %cst_11 = arith.constant 0.000000e+00 : f32
    %38 = vector.broadcast %cst_11 : f32 to vector<8x256xf32>
    %39 = vector.shape_cast %25 : vector<1x256xi1> to vector<1x256xi1>
    %40 = vector.broadcast %39 : vector<1x256xi1> to vector<8x256xi1>
    %41 = arith.select %40, %37, %38 : vector<8x256xi1>, vector<8x256xf32>
    %c8 = arith.constant 8 : index
    %c0_12 = arith.constant 0 : index
    %42 = vector.load %arg5[%c8, %c0_12] : memref<72x512xf32, #tpu.memory_space<vmem>>, vector<8x256xf32>
    tpu.vector_store %arg5[%c8, %c0_12], %41 {strides = array<i32>} : memref<72x512xf32, #tpu.memory_space<vmem>>, vector<8x256xf32>,
    %c15_i32_13 = arith.constant 15 : i32
    %43 = tpu.dynamic_rotate %29 by %c15_i32_13 dim 1 : vector<8x256xf32>, i32 -> vector<8x256xf32>
    %44 = arith.andi %25, %23 : vector<1x256xi1>
    %cst_14 = arith.constant 0.000000e+00 : f32
    %45 = vector.broadcast %cst_14 : f32 to vector<8x256xf32>
    %46 = vector.shape_cast %44 : vector<1x256xi1> to vector<1x256xi1>
    %47 = vector.broadcast %46 : vector<1x256xi1> to vector<8x256xi1>
    %48 = arith.select %47, %43, %45 : vector<8x256xi1>, vector<8x256xf32>
    %c16 = arith.constant 16 : index
    %c0_15 = arith.constant 0 : index
    %49 = vector.load %arg5[%c16, %c0_15] : memref<72x512xf32, #tpu.memory_space<vmem>>, vector<8x256xf32>
    tpu.vector_store %arg5[%c16, %c0_15], %48 {strides = array<i32>} : memref<72x512xf32, #tpu.memory_space<vmem>>, vector<8x256xf32>,
    %c1_i32_16 = arith.constant 1 : i32
    %50 = tpu.dynamic_rotate %29 by %c1_i32_16 dim 1 : vector<8x256xf32>, i32 -> vector<8x256xf32>
    %cst_17 = arith.constant 0.000000e+00 : f32
    %51 = vector.broadcast %cst_17 : f32 to vector<8x256xf32>
    %52 = vector.shape_cast %21 : vector<1x256xi1> to vector<1x256xi1>
    %53 = vector.broadcast %52 : vector<1x256xi1> to vector<8x256xi1>
    %54 = arith.select %53, %50, %51 : vector<8x256xi1>, vector<8x256xf32>
    %c24 = arith.constant 24 : index
    %c0_18 = arith.constant 0 : index
    %55 = vector.load %arg5[%c24, %c0_18] : memref<72x512xf32, #tpu.memory_space<vmem>>, vector<8x256xf32>
    tpu.vector_store %arg5[%c24, %c0_18], %54 {strides = array<i32>} : memref<72x512xf32, #tpu.memory_space<vmem>>, vector<8x256xf32>,
    %c32 = arith.constant 32 : index
    %c0_19 = arith.constant 0 : index
    %56 = vector.load %arg5[%c32, %c0_19] : memref<72x512xf32, #tpu.memory_space<vmem>>, vector<8x256xf32>
    tpu.vector_store %arg5[%c32, %c0_19], %29 {strides = array<i32>} : memref<72x512xf32, #tpu.memory_space<vmem>>, vector<8x256xf32>,
    %c255_i32 = arith.constant 255 : i32
    %57 = tpu.dynamic_rotate %29 by %c255_i32 dim 1 : vector<8x256xf32>, i32 -> vector<8x256xf32>
    %cst_20 = arith.constant 0.000000e+00 : f32
    %58 = vector.broadcast %cst_20 : f32 to vector<8x256xf32>
    %59 = vector.shape_cast %23 : vector<1x256xi1> to vector<1x256xi1>
    %60 = vector.broadcast %59 : vector<1x256xi1> to vector<8x256xi1>
    %61 = arith.select %60, %57, %58 : vector<8x256xi1>, vector<8x256xf32>
    %c40 = arith.constant 40 : index
    %c0_21 = arith.constant 0 : index
    %62 = vector.load %arg5[%c40, %c0_21] : memref<72x512xf32, #tpu.memory_space<vmem>>, vector<8x256xf32>
    tpu.vector_store %arg5[%c40, %c0_21], %61 {strides = array<i32>} : memref<72x512xf32, #tpu.memory_space<vmem>>, vector<8x256xf32>,
    %c241_i32 = arith.constant 241 : i32
    %63 = tpu.dynamic_rotate %29 by %c241_i32 dim 1 : vector<8x256xf32>, i32 -> vector<8x256xf32>
    %64 = arith.andi %27, %21 : vector<1x256xi1>
    %cst_22 = arith.constant 0.000000e+00 : f32
    %65 = vector.broadcast %cst_22 : f32 to vector<8x256xf32>
    %66 = vector.shape_cast %64 : vector<1x256xi1> to vector<1x256xi1>
    %67 = vector.broadcast %66 : vector<1x256xi1> to vector<8x256xi1>
    %68 = arith.select %67, %63, %65 : vector<8x256xi1>, vector<8x256xf32>
    %c48 = arith.constant 48 : index
    %c0_23 = arith.constant 0 : index
    %69 = vector.load %arg5[%c48, %c0_23] : memref<72x512xf32, #tpu.memory_space<vmem>>, vector<8x256xf32>
    tpu.vector_store %arg5[%c48, %c0_23], %68 {strides = array<i32>} : memref<72x512xf32, #tpu.memory_space<vmem>>, vector<8x256xf32>,
    %c240_i32_24 = arith.constant 240 : i32
    %70 = tpu.dynamic_rotate %29 by %c240_i32_24 dim 1 : vector<8x256xf32>, i32 -> vector<8x256xf32>
    %cst_25 = arith.constant 0.000000e+00 : f32
    %71 = vector.broadcast %cst_25 : f32 to vector<8x256xf32>
    %72 = vector.shape_cast %27 : vector<1x256xi1> to vector<1x256xi1>
    %73 = vector.broadcast %72 : vector<1x256xi1> to vector<8x256xi1>
    %74 = arith.select %73, %70, %71 : vector<8x256xi1>, vector<8x256xf32>
    %c56 = arith.constant 56 : index
    %c0_26 = arith.constant 0 : index
    %75 = vector.load %arg5[%c56, %c0_26] : memref<72x512xf32, #tpu.memory_space<vmem>>, vector<8x256xf32>
    tpu.vector_store %arg5[%c56, %c0_26], %74 {strides = array<i32>} : memref<72x512xf32, #tpu.memory_space<vmem>>, vector<8x256xf32>,
    %c239_i32 = arith.constant 239 : i32
    %76 = tpu.dynamic_rotate %29 by %c239_i32 dim 1 : vector<8x256xf32>, i32 -> vector<8x256xf32>
    %77 = arith.andi %27, %23 : vector<1x256xi1>
    %cst_27 = arith.constant 0.000000e+00 : f32
    %78 = vector.broadcast %cst_27 : f32 to vector<8x256xf32>
    %79 = vector.shape_cast %77 : vector<1x256xi1> to vector<1x256xi1>
    %80 = vector.broadcast %79 : vector<1x256xi1> to vector<8x256xi1>
    %81 = arith.select %80, %76, %78 : vector<8x256xi1>, vector<8x256xf32>
    %c64 = arith.constant 64 : index
    %c0_28 = arith.constant 0 : index
    %82 = vector.load %arg5[%c64, %c0_28] : memref<72x512xf32, #tpu.memory_space<vmem>>, vector<8x256xf32>
    tpu.vector_store %arg5[%c64, %c0_28], %81 {strides = array<i32>} : memref<72x512xf32, #tpu.memory_space<vmem>>, vector<8x256xf32>,
    %83 = vector.extract_strided_slice %2 {offsets = [1, 0, 0], sizes = [1, 8, 256], strides = [1, 1, 1]} : vector<2x8x256xf32> to vector<1x8x256xf32>
    %84 = vector.shape_cast %83 : vector<1x8x256xf32> to vector<8x256xf32>
    %c17_i32_29 = arith.constant 17 : i32
    %85 = tpu.dynamic_rotate %84 by %c17_i32_29 dim 1 : vector<8x256xf32>, i32 -> vector<8x256xf32>
    %86 = arith.andi %25, %21 : vector<1x256xi1>
    %cst_30 = arith.constant 0.000000e+00 : f32
    %87 = vector.broadcast %cst_30 : f32 to vector<8x256xf32>
    %88 = vector.shape_cast %86 : vector<1x256xi1> to vector<1x256xi1>
    %89 = vector.broadcast %88 : vector<1x256xi1> to vector<8x256xi1>
    %90 = arith.select %89, %85, %87 : vector<8x256xi1>, vector<8x256xf32>
    %c0_31 = arith.constant 0 : index
    %c256 = arith.constant 256 : index
    %91 = vector.load %arg5[%c0_31, %c256] : memref<72x512xf32, #tpu.memory_space<vmem>>, vector<8x256xf32>
    tpu.vector_store %arg5[%c0_31, %c256], %90 {strides = array<i32>} : memref<72x512xf32, #tpu.memory_space<vmem>>, vector<8x256xf32>,
    %c16_i32_32 = arith.constant 16 : i32
    %92 = tpu.dynamic_rotate %84 by %c16_i32_32 dim 1 : vector<8x256xf32>, i32 -> vector<8x256xf32>
    %cst_33 = arith.constant 0.000000e+00 : f32
    %93 = vector.broadcast %cst_33 : f32 to vector<8x256xf32>
    %94 = vector.shape_cast %25 : vector<1x256xi1> to vector<1x256xi1>
    %95 = vector.broadcast %94 : vector<1x256xi1> to vector<8x256xi1>
    %96 = arith.select %95, %92, %93 : vector<8x256xi1>, vector<8x256xf32>
    %c8_34 = arith.constant 8 : index
    %c256_35 = arith.constant 256 : index
    %97 = vector.load %arg5[%c8_34, %c256_35] : memref<72x512xf32, #tpu.memory_space<vmem>>, vector<8x256xf32>
    tpu.vector_store %arg5[%c8_34, %c256_35], %96 {strides = array<i32>} : memref<72x512xf32, #tpu.memory_space<vmem>>, vector<8x256xf32>,
    %c15_i32_36 = arith.constant 15 : i32
    %98 = tpu.dynamic_rotate %84 by %c15_i32_36 dim 1 : vector<8x256xf32>, i32 -> vector<8x256xf32>
    %99 = arith.andi %25, %23 : vector<1x256xi1>
    %cst_37 = arith.constant 0.000000e+00 : f32
    %100 = vector.broadcast %cst_37 : f32 to vector<8x256xf32>
    %101 = vector.shape_cast %99 : vector<1x256xi1> to vector<1x256xi1>
    %102 = vector.broadcast %101 : vector<1x256xi1> to vector<8x256xi1>
    %103 = arith.select %102, %98, %100 : vector<8x256xi1>, vector<8x256xf32>
    %c16_38 = arith.constant 16 : index
    %c256_39 = arith.constant 256 : index
    %104 = vector.load %arg5[%c16_38, %c256_39] : memref<72x512xf32, #tpu.memory_space<vmem>>, vector<8x256xf32>
    tpu.vector_store %arg5[%c16_38, %c256_39], %103 {strides = array<i32>} : memref<72x512xf32, #tpu.memory_space<vmem>>, vector<8x256xf32>,
    %c1_i32_40 = arith.constant 1 : i32
    %105 = tpu.dynamic_rotate %84 by %c1_i32_40 dim 1 : vector<8x256xf32>, i32 -> vector<8x256xf32>
    %cst_41 = arith.constant 0.000000e+00 : f32
    %106 = vector.broadcast %cst_41 : f32 to vector<8x256xf32>
    %107 = vector.shape_cast %21 : vector<1x256xi1> to vector<1x256xi1>
    %108 = vector.broadcast %107 : vector<1x256xi1> to vector<8x256xi1>
    %109 = arith.select %108, %105, %106 : vector<8x256xi1>, vector<8x256xf32>
    %c24_42 = arith.constant 24 : index
    %c256_43 = arith.constant 256 : index
    %110 = vector.load %arg5[%c24_42, %c256_43] : memref<72x512xf32, #tpu.memory_space<vmem>>, vector<8x256xf32>
    tpu.vector_store %arg5[%c24_42, %c256_43], %109 {strides = array<i32>} : memref<72x512xf32, #tpu.memory_space<vmem>>, vector<8x256xf32>,
    %c32_44 = arith.constant 32 : index
    %c256_45 = arith.constant 256 : index
    %111 = vector.load %arg5[%c32_44, %c256_45] : memref<72x512xf32, #tpu.memory_space<vmem>>, vector<8x256xf32>
    tpu.vector_store %arg5[%c32_44, %c256_45], %84 {strides = array<i32>} : memref<72x512xf32, #tpu.memory_space<vmem>>, vector<8x256xf32>,
    %c255_i32_46 = arith.constant 255 : i32
    %112 = tpu.dynamic_rotate %84 by %c255_i32_46 dim 1 : vector<8x256xf32>, i32 -> vector<8x256xf32>
    %cst_47 = arith.constant 0.000000e+00 : f32
    %113 = vector.broadcast %cst_47 : f32 to vector<8x256xf32>
    %114 = vector.shape_cast %23 : vector<1x256xi1> to vector<1x256xi1>
    %115 = vector.broadcast %114 : vector<1x256xi1> to vector<8x256xi1>
    %116 = arith.select %115, %112, %113 : vector<8x256xi1>, vector<8x256xf32>
    %c40_48 = arith.constant 40 : index
    %c256_49 = arith.constant 256 : index
    %117 = vector.load %arg5[%c40_48, %c256_49] : memref<72x512xf32, #tpu.memory_space<vmem>>, vector<8x256xf32>
    tpu.vector_store %arg5[%c40_48, %c256_49], %116 {strides = array<i32>} : memref<72x512xf32, #tpu.memory_space<vmem>>, vector<8x256xf32>,
    %c241_i32_50 = arith.constant 241 : i32
    %118 = tpu.dynamic_rotate %84 by %c241_i32_50 dim 1 : vector<8x256xf32>, i32 -> vector<8x256xf32>
    %119 = arith.andi %27, %21 : vector<1x256xi1>
    %cst_51 = arith.constant 0.000000e+00 : f32
    %120 = vector.broadcast %cst_51 : f32 to vector<8x256xf32>
    %121 = vector.shape_cast %119 : vector<1x256xi1> to vector<1x256xi1>
    %122 = vector.broadcast %121 : vector<1x256xi1> to vector<8x256xi1>
    %123 = arith.select %122, %118, %120 : vector<8x256xi1>, vector<8x256xf32>
    %c48_52 = arith.constant 48 : index
    %c256_53 = arith.constant 256 : index
    %124 = vector.load %arg5[%c48_52, %c256_53] : memref<72x512xf32, #tpu.memory_space<vmem>>, vector<8x256xf32>
    tpu.vector_store %arg5[%c48_52, %c256_53], %123 {strides = array<i32>} : memref<72x512xf32, #tpu.memory_space<vmem>>, vector<8x256xf32>,
    %c240_i32_54 = arith.constant 240 : i32
    %125 = tpu.dynamic_rotate %84 by %c240_i32_54 dim 1 : vector<8x256xf32>, i32 -> vector<8x256xf32>
    %cst_55 = arith.constant 0.000000e+00 : f32
    %126 = vector.broadcast %cst_55 : f32 to vector<8x256xf32>
    %127 = vector.shape_cast %27 : vector<1x256xi1> to vector<1x256xi1>
    %128 = vector.broadcast %127 : vector<1x256xi1> to vector<8x256xi1>
    %129 = arith.select %128, %125, %126 : vector<8x256xi1>, vector<8x256xf32>
    %c56_56 = arith.constant 56 : index
    %c256_57 = arith.constant 256 : index
    %130 = vector.load %arg5[%c56_56, %c256_57] : memref<72x512xf32, #tpu.memory_space<vmem>>, vector<8x256xf32>
    tpu.vector_store %arg5[%c56_56, %c256_57], %129 {strides = array<i32>} : memref<72x512xf32, #tpu.memory_space<vmem>>, vector<8x256xf32>,
    %c239_i32_58 = arith.constant 239 : i32
    %131 = tpu.dynamic_rotate %84 by %c239_i32_58 dim 1 : vector<8x256xf32>, i32 -> vector<8x256xf32>
    %132 = arith.andi %27, %23 : vector<1x256xi1>
    %cst_59 = arith.constant 0.000000e+00 : f32
    %133 = vector.broadcast %cst_59 : f32 to vector<8x256xf32>
    %134 = vector.shape_cast %132 : vector<1x256xi1> to vector<1x256xi1>
    %135 = vector.broadcast %134 : vector<1x256xi1> to vector<8x256xi1>
    %136 = arith.select %135, %131, %133 : vector<8x256xi1>, vector<8x256xf32>
    %c64_60 = arith.constant 64 : index
    %c256_61 = arith.constant 256 : index
    %137 = vector.load %arg5[%c64_60, %c256_61] : memref<72x512xf32, #tpu.memory_space<vmem>>, vector<8x256xf32>
    tpu.vector_store %arg5[%c64_60, %c256_61], %136 {strides = array<i32>} : memref<72x512xf32, #tpu.memory_space<vmem>>, vector<8x256xf32>,
    %c0_62 = arith.constant 0 : index
    %c0_63 = arith.constant 0 : index
    %138 = vector.load %arg2[%c0_62, %c0_63] : memref<8x72xf32, #tpu.memory_space<vmem>>, vector<8x72xf32>
    %c0_64 = arith.constant 0 : index
    %c0_65 = arith.constant 0 : index
    %139 = vector.load %arg5[%c0_64, %c0_65] : memref<72x512xf32, #tpu.memory_space<vmem>>, vector<72x512xf32>
    %cst_66 = arith.constant dense<0.000000e+00> : vector<8x512xf32>
    %140 = tpu.matmul %138, %139, %cst_66 {dimension_numbers = #tpu.dot_dimension_numbers<[1], [0], [0], [1], [0, 0, 1, 1], [], []>} : vector<8x72xf32>, vector<72x512xf32>, vector<8x512xf32> -> vector<8x512xf32>
    %c0_67 = arith.constant 0 : index
    %c0_68 = arith.constant 0 : index
    %141 = vector.load %arg3[%c0_67, %c0_68] : memref<8x1xf32, #tpu.memory_space<vmem>>, vector<8x1xf32>
    %142 = vector.broadcast %141 : vector<8x1xf32> to vector<8x512xf32>
    %143 = arith.addf %140, %142 : vector<8x512xf32>
    %144 = vector.extract_strided_slice %143 {offsets = [0, 0], sizes = [8, 256], strides = [1, 1]} : vector<8x512xf32> to vector<8x256xf32>
    %c0_69 = arith.constant 0 : index
    %c0_70 = arith.constant 0 : index
    %c0_71 = arith.constant 0 : index
    %145 = vector.load %arg4[%c0_69, %c0_70, %c0_71] : memref<2x8x256xf32, #tpu.memory_space<vmem>>, vector<1x8x256xf32>
    %146 = vector.shape_cast %145 : vector<1x8x256xf32> to vector<8x256xf32>
    %147 = vector.shape_cast %144 : vector<8x256xf32> to vector<1x8x256xf32>
    tpu.vector_store %arg4[%c0_69, %c0_70, %c0_71], %147 {strides = array<i32>} : memref<2x8x256xf32, #tpu.memory_space<vmem>>, vector<1x8x256xf32>,
    %148 = vector.extract_strided_slice %143 {offsets = [0, 256], sizes = [8, 256], strides = [1, 1]} : vector<8x512xf32> to vector<8x256xf32>
    %c1 = arith.constant 1 : index
    %c0_72 = arith.constant 0 : index
    %c0_73 = arith.constant 0 : index
    %149 = vector.load %arg4[%c1, %c0_72, %c0_73] : memref<2x8x256xf32, #tpu.memory_space<vmem>>, vector<1x8x256xf32>
    %150 = vector.shape_cast %149 : vector<1x8x256xf32> to vector<8x256xf32>
    %151 = vector.shape_cast %148 : vector<8x256xf32> to vector<1x8x256xf32>
    tpu.vector_store %arg4[%c1, %c0_72, %c0_73], %151 {strides = array<i32>} : memref<2x8x256xf32, #tpu.memory_space<vmem>>, vector<1x8x256xf32>,
    return
  }
  func.func @transform_0(%arg0: i32) -> (i32, i32, i32) {
    %c0_i32 = arith.constant 0 : i32
    %c0_i32_0 = arith.constant 0 : i32
    %c0_i32_1 = arith.constant 0 : i32
    return %arg0, %c0_i32, %c0_i32_0 : i32, i32, i32
  }
  func.func @transform_1(%arg0: i32) -> (i32, i32) {
    %c0_i32 = arith.constant 0 : i32
    %c0_i32_0 = arith.constant 0 : i32
    %c0_i32_1 = arith.constant 0 : i32
    return %c0_i32, %c0_i32_0 : i32, i32
  }
  func.func @transform_2(%arg0: i32) -> (i32, i32) {
    %c0_i32 = arith.constant 0 : i32
    %c0_i32_0 = arith.constant 0 : i32
    %c0_i32_1 = arith.constant 0 : i32
    return %c0_i32, %c0_i32_0 : i32, i32
  }
  func.func @transform_3(%arg0: i32) -> (i32, i32, i32) {
    %c0_i32 = arith.constant 0 : i32
    %c0_i32_0 = arith.constant 0 : i32
    %c0_i32_1 = arith.constant 0 : i32
    return %arg0, %c0_i32, %c0_i32_0 : i32, i32, i32
  }
}

</mosaic_0001>

<bundles_post_ra>
// kernel: tpu_custom_call.1
= control target key start
LH: loop header
LB: loop body
LE: loop exit
PB: predicated region body
PF: predicated region fallthrough
CT: control target
= control target key end

     0   :  { %8 = vsyncpa [#allocation4], 0  ;;  %s1256_s0 = inlined_call_operand.hbm [shape: f32[4,4,256], index: 0, kind: input, shape index: {}]   ;;  %s1257_s1 = inlined_call_operand.vmem [shape: f32[8,72], index: 1, kind: input, shape index: {}]   ;;  %s1258_s2 = inlined_call_operand.vmem [shape: f32[8,1], index: 2, kind: input, shape index: {}]   ;;  %s1259_s3 = inlined_call_operand.hbm [shape: f32[4,8,256], index: 3, kind: output, shape index: {}]  }
   0x1   :  { %10 = vsyncpa [#allocation4 + $0x1], 0 }
   0x2   :  { %11 = vsyncpa [#allocation5], 0 }
   0x3   :  { %13 = vsyncpa [#allocation5 + $0x1], 0  ;;  %s981_s12 = smov 0   ;;  %s983_s13 = smov 0  }
   0x4   :  { %s985_s14 = smov 0   ;;  %s987_s15 = smov 0  }
   0x5 LB: > { %s1002_s16 = sadd.s32 4294967295, %s944_s15   ;;  %s734_s17 = sadd.s32 4294967294, %s944_s15   ;;  %s944_s15 = sphi %s987_s15, %s1282_s15   ;;  %s940_s14 = sphi %s985_s14, %s1281_s14   ;;  %s936_s13 = sphi %s983_s13, %s1280_s13   ;;  %s932_s12 = sphi %s981_s12, %s1279_s12  }
   0x6   : > { %s1006_s18 = sadd.s32 1, %s944_s15   ;;  %s26_s19 = sadd.s32 1, %s940_s14 }
   0x7   : > { %s23_s20 = ssub.s32 %s944_s15, %s1006_s18  ;;  %p33_p0 = scmp.ne.s32.totalorder %s940_s14, %s936_s13 }
   0x8   : > { %p24_p1 = scmp.eq.s32.totalorder %s23_s20, 0  ;;  %p34_p2 = scmp.eq.s32.totalorder %s944_s15, 0 }
   0x9   : > { %p39_p3 = scmp.ne.s32.totalorder %s936_s13, %s932_s12  ;;  %p40_p4 = scmp.eq.s32.totalorder %s1002_s16, 0 }
   0xa   : > { %s1018_s21 = scalar_select %p24_p1, %s940_s14, %s26_s19  }
   0xb   : > { %p1020_p5 = por %p34_p2, %p33_p0  ;;  %p1024_p6 = por %p40_p4, %p39_p3 }
   0xc   : > { %p105_p7 = scmp.eq.s32.totalorder %s1002_s16, 1  ;;  %p111_p8 = scmp.eq.s32.totalorder %s734_s17, 1 }
   0xd   : > { %s1263_s23 = scalar_select %p1024_p6, 1, 0 }
   0xe   : > { %p802_p10 = scmp.lt.s32.totalorder %s944_s15, 2  ;;  %p1031_p11 = por %p105_p7, %p33_p0 }
   0xf   : > { %p1035_p12 = por %p111_p8, %p39_p3  ;;  %s137_s26 = sand.u32 1, %s940_s14  }
  0x10   : > { %s1264_s24 = scalar_select %p1031_p11, 1, 0 }
  0x11   : > { %s1265_s25 = scalar_select %p1035_p12, 1, 0 }
  0x12   : > { %s755_s27 = sshll.u32 %s944_s15, 8  ;;  %s737_s28 = sshll.u32 %s137_s26, 4 }
  0x13   : > { %s1044_s4 = scalar_lea.hbm %s1256_s0, %s755_s27  ;;  %s141_s5 = scalar_lea.vmem [#allocation3], %s737_s28 }
  0x14   : > { %s149_s6 = sshll.u32 %s141_s5, 4  ;;  %p1048_p13 = pnand %p802_p10, %p1020_p5  ;;  %s1052_s6 = int_to_ptr.vmem [resolvable:$true] %s149_s6 }
  0x15   : > { %s1054_s8 = scalar_lea.sflag [#allocation4], %s137_s26  ;;  %s852_s9 = scalar_lea.hbm %s1044_s4, 256 }
  0x16   : > { %p853_p0 = scmp.ne.s32.totalorder %s1044_s4, %s852_s9  ;;  %p854_p1 = pneg %p1048_p13 }
  0x17   : > { %s857_s17 = scalar_lea.hbm %s1256_s0, 512  ;;  %p858_p4 = scmp.lt.s32.totalorder %s1044_s4, %s1256_s0 }
  0x18   : > { %p855_p2 = pnand %p854_p1, %p853_p0  ;;  %p859_p5 = scmp.lt.s32.totalorder %s857_s17, %s852_s9 }
  0x1a   : > { %p856_p3 = pneg %p855_p2  ;;  %p860_p7 = por %p859_p5, %p858_p4 }
  0x1c   : > { %p861_p8 = pnand %p860_p7, %p856_p3 }
  0x1e   : > { %864 = shalt.err (!%p861_p8)
}
  0x1f   : > { %s865_s22 = scalar_lea.vmem %s1052_s6, 256  ;;  %s946_s26 = smov [#allocation3]  }
  0x20   : > { %p866_p10 = scmp.ne.s32.totalorder %s1052_s6, %s865_s22  ;;  %s870_s27 = sshll.u32 %s946_s26, 4  ;;  %s871_s27 = int_to_ptr.vmem [resolvable:$false] %s870_s27 }
  0x21   : > { %s872_s28 = scalar_lea.vmem %s871_s27, 512  ;;  %p873_p2 = scmp.lt.s32.totalorder %s1052_s6, %s871_s27 }
  0x22   : > { %p868_p9 = pnand %p866_p10, %p854_p1  ;;  %p874_p12 = scmp.lt.s32.totalorder %s872_s28, %s865_s22 }
  0x24   : > { %p869_p0 = pneg %p868_p9  ;;  %p875_p11 = por %p874_p12, %p873_p2 }
  0x26   : > { %p876_p6 = pnand %p875_p11, %p869_p0 }
  0x28   : > { %879 = shalt.err (!%p876_p6)
}
  0x29   : > { %s947_s29 = smov 128   ;;  %s948_s30 = smov 8  }
  0x2a   : > { %797 = dma.hbm_to_vmem [thread:$0]  (!%p1048_p13), %s1044_s4, 256, %s1052_s6, %s1054_s8, %s947_s29, %s947_s29, %s948_s30  }
  0x2b   : > { %p741_p9 = scmp.ge.s32.totalorder %s944_s15, 1  ;;  %p157_p1 = scmp.lt.s32.totalorder %s944_s15, 3 }
  0x2d   : > { %p158_p3 = pnand %p741_p9, %p157_p1 }
  0x2e   : > { %s1078_s5 = sand.u32 (!%p158_p3), 1, %s936_s13   ;;  %p1267_p6 = scmp.ne.s32.totalorder (!%p158_p3), %s1263_s23, 0 }
  0x2f   : > { %161 = sbr.rel (%p158_p3) target bundleno = 444 (0x1bc), region = 32  ;;  %s742_s9 = sshll.u32 (!%p158_p3), %s1078_s5, 4 }
  0x30   : > { %s164_s10 = scalar_lea.sflag (!%p158_p3), [#allocation4], %s1078_s5  ;;  %s167_s11 = scalar_lea.vmem (!%p158_p3), [#allocation3], %s742_s9 }
  0x34   : > { %923 = dma.done.wait (%p1267_p6), %s164_s10, 256  }
  0x35   : > { %925 = vsyncadd (%p1267_p6), %s164_s10, 4294967040  ;;  %vm200_vm0 = vcmask 1043456   ;;  %v1086_v0 = vld [vmem:[%s167_s11 + $0x8] sm:$0xff]  ;;  %v1088_v1 = vld [vmem:[%s167_s11] sm:$0xff]  ;;  %s949_s4 = smov 111   ;;  %s950_s23 = smov 112   ;;  %v205_v11 = vlaneseq }
  0x36   : > { %v203_v2 = vsel %vm200_vm0, %v1086_v0, 0.0  ;;  %v201_v3 = vsel %vm200_vm0, %v1088_v1, 0.0  ;;  %v1096_v4 = vcombine.high %v1086_v0, %v1086_v0  ;;  %v1102_v6 = vcombine.high %v1088_v1, %v1088_v1  ;;  %s951_s6 = smov 113   ;;  %s952_s7 = smov 127   ;;  %v489_v10 = vld [vmem:[%s1258_s2] sm:$0xff] }
  0x37   : > { %442 = vrot.lane.b32.xlu1 %v203_v2, %s949_s4  ;;  %353 = vrot.lane.b32.xlu0 %v201_v3, %s949_s4  ;;  %s953_s8 = smov 1   ;;  %s954_s17 = smov 15   ;;  %v955_v8 = vmov 0.0   ;;  %v957_v9 = vmov 0   ;;  %v1113_v12 = vand.u32 127, %v205_v11  ;;  %v452_v17 = vld [vmem:[%s1257_s1] sm:$0xff] }
  0x38   : > { %v204_v5 = vsel %vm200_vm0, %v1096_v4, 0.0  ;;  %v202_v7 = vsel %vm200_vm0, %v1102_v6, 0.0  ;;  %563 = vmatprep.mubr.f32.mxu0 %v955_v8  ;;  %634 = vmatprep.mubr.f32.mxu1 %v955_v8  ;;  %s956_s19 = smov 16   ;;  %s958_s20 = smov 17  }
  0x39   : > { %849 = vset.pattern.permute.xlu0 %v957_v9  ;;  %v207_v13 = vadd.s32 128, %v1113_v12  ;;  %v212_v18 = vand.u32 15, %v1113_v12  ;;  %vm357_vm3 = vcmp.lt.s32.totalorder %v1113_v12, 111  ;;  %vm342_vm6 = vcmp.lt.s32.totalorder %v1113_v12, 112  ;;  %s743_s29 = sshll.u32 %s1078_s5, 5  ;;  %s757_s10 = sshll.u32 %s1002_s16, 9 }
  0x3a   : > { %vm325_vm8 = vcmp.lt.s32.totalorder %v1113_v12, 113  ;;  %vm310_vm11 = vcmp.lt.s32.totalorder %v1113_v12, 127  ;;  %vm293_vm12 = vcmp.lt.s32.totalorder %v1113_v12, 1  ;;  %vm236_vm13 = vcmp.ge.s32.totalorder %v1113_v12, 16  ;;  %s189_s30 = scalar_lea.vmem [#allocation6], %s743_s29  ;;  %p1276_p12 = scmp.ne.s32.totalorder %s1264_s24, 0 }
  0x3b   : > { %444 = vrot.lane.b32.xlu1 %v204_v5, %s949_s4  ;;  %338 = vrot.lane.b32.xlu0 %v201_v3, %s950_s23  ;;  %v219_v14 = vand.u32 15, %v207_v13  ;;  %vm239_vm2 = vcmp.lt.s32.totalorder %v207_v13, 240  ;;  %vm1125_vm5 = vcmp.lt.s32.totalorder %v212_v18, 15  ;;  %vm1144_vm10 = vcmp.gt.s32.totalorder %v212_v18, 0  ;;  %s661_s9 = sshll.u32 %s189_s30, 4  ;;  %s959_s16 = smov [#allocation6]   ;;  %s1207_s9 = int_to_ptr.vmem [resolvable:$true] %s661_s9 }
  0x3c   : > { %vm276_vm14 = vcmp.lt.s32.totalorder %v1113_v12, 15  ;;  %vm279_vm15 = vmand %vm236_vm13, %vm1125_vm5 }
  0x3d   : > { %vm1116_vm1 = vcmp.lt.s32.totalorder %v219_v14, 15  ;;  %vm1135_vm7 = vcmp.gt.s32.totalorder %v219_v14, 0 }
  0x3e   : > { %vm361_vm4 = vmand %vm239_vm2, %vm1116_vm1 }
  0x3f   : > { %340 = vrot.lane.b32.xlu1 %v202_v7, %s950_s23  ;;  %355 = vrot.lane.b32.xlu0 %v202_v7, %s949_s4  ;;  %vm329_vm9 = vmand %vm239_vm2, %vm1135_vm7 }
  0x43   : > { %434 = vrot.lane.b32.xlu1 %v204_v5, %s950_s23  ;;  %432 = vrot.lane.b32.xlu0 %v203_v2, %s950_s23  ;;  %s1212_s23 = scalar_lea.hbm %s1259_s3, %s757_s10 }
  0x47   : > { %323 = vrot.lane.b32.xlu1 %v202_v7, %s951_s6  ;;  %321 = vrot.lane.b32.xlu0 %v201_v3, %s951_s6 }
  0x4b   : > { %424 = vrot.lane.b32.xlu1 %v204_v5, %s951_s6  ;;  %422 = vrot.lane.b32.xlu0 %v203_v2, %s951_s6  ;;  %s647_s6 = scalar_lea.sflag [#allocation5], %s1078_s5 }
  0x4f   : > { %308 = vrot.lane.b32.xlu1 %v202_v7, %s952_s7  ;;  %306 = vrot.lane.b32.xlu0 %v201_v3, %s952_s7 }
  0x53   : > { %414 = vrot.lane.b32.xlu1 %v204_v5, %s952_s7  ;;  %412 = vrot.lane.b32.xlu0 %v203_v2, %s952_s7  ;;  %s880_s7 = scalar_lea.vmem %s1207_s9, 512 }
  0x54   : > { %p881_p11 = scmp.ne.s32.totalorder %s1207_s9, %s880_s7 }
  0x56   : > { %p882_p13 = pnand %p881_p11, %p1276_p12 }
  0x57   : > { %291 = vrot.lane.b32.xlu1 %v202_v7, %s953_s8  ;;  %289 = vrot.lane.b32.xlu0 %v201_v3, %s953_s8 }
  0x58   : > { %p883_p4 = pneg %p882_p13 }
  0x5b   : > { %402 = vrot.lane.b32.xlu1 %v204_v5, %s953_s8  ;;  %400 = vrot.lane.b32.xlu0 %v203_v2, %s953_s8  ;;  %s884_s8 = sshll.u32 %s959_s16, 4  ;;  %s885_s8 = int_to_ptr.vmem [resolvable:$false] %s884_s8 }
  0x5c   : > { %p887_p5 = scmp.lt.s32.totalorder %s1207_s9, %s885_s8 }
  0x5f   : > { %274 = vrot.lane.b32.xlu1 %v202_v7, %s954_s17  ;;  %272 = vrot.lane.b32.xlu0 %v201_v3, %s954_s17 }
  0x63   : > { %392 = vrot.lane.b32.xlu1 %v204_v5, %s954_s17  ;;  %390 = vrot.lane.b32.xlu0 %v203_v2, %s954_s17  ;;  %s886_s17 = scalar_lea.vmem %s885_s8, 1024 }
  0x64   : > { %p888_p7 = scmp.lt.s32.totalorder %s886_s17, %s880_s7 }
  0x66   : > { %p889_p8 = por %p888_p7, %p887_p5 }
  0x67   : > { %259 = vrot.lane.b32.xlu1 %v202_v7, %s956_s19  ;;  %257 = vrot.lane.b32.xlu0 %v201_v3, %s956_s19 }
  0x68   : > { %p890_p10 = pnand %p889_p8, %p883_p4 }
  0x6b   : > { %382 = vrot.lane.b32.xlu1 %v204_v5, %s956_s19  ;;  %380 = vrot.lane.b32.xlu0 %v203_v2, %s956_s19 }
  0x6f   : > { %242 = vrot.lane.b32.xlu1 %v202_v7, %s958_s20  ;;  %240 = vrot.lane.b32.xlu0 %v201_v3, %s958_s20 }
  0x73   : > { %372 = vrot.lane.b32.xlu1 %v204_v5, %s958_s20  ;;  %370 = vrot.lane.b32.xlu0 %v203_v2, %s958_s20 }
  0x77   : > { %492 = vperm.xlu0 %849, %v489_v10  }
  0xa9   : > { %v443_v15 = vpop.permute.xlu1 %442  ;;  %v354_v16 = vpop.permute.xlu0 %353 }
  0xad   : > { %v445_v19 = vpop.permute.xlu1 %444  ;;  %v339_v20 = vpop.permute.xlu0 %338 }
  0xae   : > { %v447_v22 = vsel %vm357_vm3, %v445_v19, %v443_v15  ;;  %v446_v23 = vsel %vm357_vm3, %v443_v15, %v445_v19 }
  0xaf   : > { %774 = vmatprep.subr.msk.mxu1 %vm361_vm4, %v447_v22 }
  0xb0   : > { %775 = vmatpush1.msk.msra.mxu1 %vm1125_vm5, %v446_v23 }
  0xb1   : > { %v341_v24 = vpop.permute.xlu1 %340  ;;  %v356_v25 = vpop.permute.xlu0 %355 }
  0xb2   : > { %v359_v26 = vsel %vm357_vm3, %v356_v25, %v354_v16  ;;  %v358_v27 = vsel %vm357_vm3, %v354_v16, %v356_v25  ;;  %v344_v28 = vsel %vm342_vm6, %v341_v24, %v339_v20  ;;  %v343_v31 = vsel %vm342_vm6, %v339_v20, %v341_v24 }
  0xb3   : > { %758 = vmatprep.subr.msk.mxu0 %vm361_vm4, %v359_v26  ;;  %vm495_vm3 = vcmask 588800  }
  0xb4   : > { %759 = vmatpush1.msk.msra.mxu0 %vm1125_vm5, %v358_v27 }
  0xb5   : > { %v435_v29 = vpop.permute.xlu1 %434  ;;  %760 = vmatprep.subr.msk.mxu0 %vm239_vm2, %v344_v28  ;;  %v433_v30 = vpop.permute.xlu0 %432 }
  0xb6   : > { %v437_v33 = vsel %vm342_vm6, %v435_v29, %v433_v30  ;;  %516 = vmatpush1.msra.mxu0 %v343_v31  ;;  %v436_v34 = vsel %vm342_vm6, %v433_v30, %v435_v29 }
  0xb7   : > { %776 = vmatprep.subr.msk.mxu1 %vm239_vm2, %v437_v33  ;;  %vm244_vm2 = vcmp.lt.s32.totalorder %v1113_v12, 17 }
  0xb8   : > { %587 = vmatpush1.msra.mxu1 %v436_v34 }
  0xb9   : > { %v324_v35 = vpop.permute.xlu1 %323  ;;  %v322_v36 = vpop.permute.xlu0 %321 }
  0xba   : > { %v326_v38 = vsel %vm325_vm8, %v322_v36, %v324_v35  ;;  %v327_v39 = vsel %vm325_vm8, %v324_v35, %v322_v36 }
  0xbb   : > { %761 = vmatprep.subr.msk.mxu0 %vm329_vm9, %v327_v39 }
  0xbc   : > { %762 = vmatpush1.msk.msra.mxu0 %vm1144_vm10, %v326_v38 }
  0xbd   : > { %v425_v40 = vpop.permute.xlu1 %424  ;;  %v423_v41 = vpop.permute.xlu0 %422 }
  0xbe   : > { %v426_v42 = vsel %vm325_vm8, %v423_v41, %v425_v40  ;;  %v427_v43 = vsel %vm325_vm8, %v425_v40, %v423_v41 }
  0xbf   : > { %777 = vmatprep.subr.msk.mxu1 %vm329_vm9, %v427_v43 }
  0xc0   : > { %778 = vmatpush1.msk.msra.mxu1 %vm1144_vm10, %v426_v42 }
  0xc1   : > { %v309_v44 = vpop.permute.xlu1 %308  ;;  %v307_v45 = vpop.permute.xlu0 %306 }
  0xc2   : > { %v311_v46 = vsel %vm310_vm11, %v307_v45, %v309_v44  ;;  %v312_v47 = vsel %vm310_vm11, %v309_v44, %v307_v45 }
  0xc3   : > { %763 = vmatprep.subr.msk.mxu0 %vm1116_vm1, %v312_v47 }
  0xc4   : > { %764 = vmatpush1.msk.msra.mxu0 %vm1125_vm5, %v311_v46 }
  0xc5   : > { %v415_v48 = vpop.permute.xlu1 %414  ;;  %v413_v49 = vpop.permute.xlu0 %412  ;;  %765 = vmatprep.subr.msk.mxu0 %vm200_vm0, %v1102_v6 }
  0xc6   : > { %v416_v50 = vsel %vm310_vm11, %v413_v49, %v415_v48  ;;  %v417_v51 = vsel %vm310_vm11, %v415_v48, %v413_v49  ;;  %766 = vmatpush1.msk.msra.mxu0 %vm200_vm0, %v1088_v1 }
  0xc7   : > { %779 = vmatprep.subr.msk.mxu1 %vm1116_vm1, %v417_v51 }
  0xc8   : > { %780 = vmatpush1.msk.msra.mxu1 %vm1125_vm5, %v416_v50 }
  0xc9   : > { %v292_v52 = vpop.permute.xlu1 %291  ;;  %v290_v53 = vpop.permute.xlu0 %289  ;;  %781 = vmatprep.subr.msk.mxu1 %vm200_vm0, %v1096_v4 }
  0xca   : > { %v294_v54 = vsel %vm293_vm12, %v290_v53, %v292_v52  ;;  %v295_v55 = vsel %vm293_vm12, %v292_v52, %v290_v53  ;;  %782 = vmatpush1.msk.msra.mxu1 %vm200_vm0, %v1086_v0  ;;  %vm261_vm0 = vcmp.lt.s32.totalorder %v1113_v12, 16 }
  0xcb   : > { %767 = vmatprep.subr.msk.mxu0 %vm1135_vm7, %v294_v54 }
  0xcc   : > { %768 = vmatpush1.msk.msra.mxu0 %vm1144_vm10, %v295_v55 }
  0xcd   : > { %v403_v56 = vpop.permute.xlu1 %402  ;;  %v401_v57 = vpop.permute.xlu0 %400 }
  0xce   : > { %v404_v58 = vsel %vm293_vm12, %v401_v57, %v403_v56  ;;  %v405_v59 = vsel %vm293_vm12, %v403_v56, %v401_v57 }
  0xcf   : > { %783 = vmatprep.subr.msk.mxu1 %vm1135_vm7, %v404_v58 }
  0xd0   : > { %784 = vmatpush1.msk.msra.mxu1 %vm1144_vm10, %v405_v59 }
  0xd1   : > { %v275_v60 = vpop.permute.xlu1 %274  ;;  %v273_v61 = vpop.permute.xlu0 %272 }
  0xd2   : > { %v277_v62 = vsel %vm276_vm14, %v273_v61, %v275_v60  ;;  %v278_v63 = vsel %vm276_vm14, %v275_v60, %v273_v61 }
  0xd3   : > { %769 = vmatprep.subr.msk.mxu0 %vm1116_vm1, %v277_v62 }
  0xd4   : > { %770 = vmatpush1.msk.msra.mxu0 %vm279_vm15, %v278_v63 }
  0xd5   : > { %v393_v0 = vpop.permute.xlu1 %392  ;;  %v391_v1 = vpop.permute.xlu0 %390 }
  0xd6   : > { %v394_v2 = vsel %vm276_vm14, %v391_v1, %v393_v0  ;;  %v395_v3 = vsel %vm276_vm14, %v393_v0, %v391_v1 }
  0xd7   : > { %785 = vmatprep.subr.msk.mxu1 %vm1116_vm1, %v394_v2  ;;  %vm247_vm1 = vmand %vm236_vm13, %vm1144_vm10 }
  0xd8   : > { %786 = vmatpush1.msk.msra.mxu1 %vm279_vm15, %v395_v3 }
  0xd9   : > { %v260_v4 = vpop.permute.xlu1 %259  ;;  %v258_v5 = vpop.permute.xlu0 %257 }
  0xda   : > { %v263_v6 = vsel %vm261_vm0, %v260_v4, %v258_v5  ;;  %v262_v7 = vsel %vm261_vm0, %v258_v5, %v260_v4 }
  0xdb   : > { %527 = vmatprep.subr.mxu0 %v262_v7 }
  0xdc   : > { %771 = vmatpush1.msk.msra.mxu0 %vm236_vm13, %v263_v6 }
  0xdd   : > { %v383_v8 = vpop.permute.xlu1 %382  ;;  %v381_v9 = vpop.permute.xlu0 %380 }
  0xde   : > { %v385_v10 = vsel %vm261_vm0, %v383_v8, %v381_v9  ;;  %v384_v11 = vsel %vm261_vm0, %v381_v9, %v383_v8 }
  0xdf   : > { %598 = vmatprep.subr.mxu1 %v384_v11 }
  0xe0   : > { %787 = vmatpush1.msk.msra.mxu1 %vm236_vm13, %v385_v10 }
  0xe1   : > { %v243_v13 = vpop.permute.xlu1 %242  ;;  %v241_v14 = vpop.permute.xlu0 %240 }
  0xe2   : > { %v245_v15 = vsel %vm244_vm2, %v241_v14, %v243_v13  ;;  %v246_v16 = vsel %vm244_vm2, %v243_v13, %v241_v14 }
  0xe3   : > { %772 = vmatprep.subr.msk.mxu0 %vm1135_vm7, %v245_v15 }
  0xe4   : > { %773 = vmatpush1.msk.msra.mxu0 %vm247_vm1, %v246_v16 }
  0xe5   : > { %v373_v18 = vpop.permute.xlu1 %372  ;;  %v371_v19 = vpop.permute.xlu0 %370  ;;  %744 = vmatmul.mubr.msk.f32.vlgmr.msra.gmra.mxu0 %vm495_vm3, %v452_v17 }
  0xe6   : > { %v374_v20 = vsel %vm244_vm2, %v371_v19, %v373_v18  ;;  %v375_v21 = vsel %vm244_vm2, %v373_v18, %v371_v19 }
  0xe7   : > { %788 = vmatprep.subr.msk.mxu1 %vm1135_vm7, %v374_v20 }
  0xe8   : > { %789 = vmatpush1.msk.msra.mxu1 %vm247_vm1, %v375_v21 }
  0xe9   : > { %745 = vmatmul.mubr.msk.f32.vlgmr.msra.gmra.mxu1 %vm495_vm3, %v452_v17 }
  0xf2   : > { %v493_v12 = vpop.permute.xlu0 %492 }
 0x1a5   : > { %v565_v22 = vpop.f32.mrf.mxu0 }
 0x1a6   : > { %v566_v23 = vadd.f32 %v565_v22, %v493_v12 }
 0x1a7   : > { %v567_v24 = vpop.f32.mrf.mxu0 }
 0x1a8   : > { %v568_v25 = vadd.f32 %v567_v24, %v493_v12  ;;  %641 = vst [vmem:[%s189_s30] sm:$0xff] %v566_v23 }
 0x1a9   : > { %v636_v26 = vpop.f32.mrf.mxu1 }
 0x1aa   : > { %v637_v27 = vadd.f32 %v636_v26, %v493_v12  ;;  %642 = vst [vmem:[%s189_s30 + $0x8] sm:$0xff] %v568_v25 }
 0x1ab   : > { %v638_v28 = vpop.f32.mrf.mxu1 }
 0x1ac   : > { %746 = vst [vmem:[%s189_s30 + $0x10] sm:$0xff] %v637_v27  ;;  %v639_v29 = vadd.f32 %v638_v28, %v493_v12 }
 0x1ae   : > { %747 = vst [vmem:[%s189_s30 + $0x18] sm:$0xff] %v639_v29 }
 0x1af   : > { %893 = shalt.err (!%p890_p10)
}
 0x1b0   : > { %s894_s20 = scalar_lea.hbm %s1212_s23, 512  ;;  %s898_s27 = scalar_lea.hbm %s1259_s3, 1024 }
 0x1b1   : > { %p895_p0 = scmp.ne.s32.totalorder %s1212_s23, %s894_s20  ;;  %p899_p1 = scmp.lt.s32.totalorder %s1212_s23, %s1259_s3 }
 0x1b2   : > { %p900_p3 = scmp.lt.s32.totalorder %s898_s27, %s894_s20 }
 0x1b3   : > { %p896_p2 = pnand %p895_p0, %p1276_p12 }
 0x1b4   : > { %p901_p6 = por %p900_p3, %p899_p1 }
 0x1b5   : > { %p897_p9 = pneg %p896_p2 }
 0x1b7   : > { %p902_p11 = pnand %p901_p6, %p897_p9 }
 0x1b9   : > { %905 = shalt.err (!%p902_p11)
}
 0x1ba   : > { %s960_s30 = smov 256  }
 0x1bb   : > { %792 = dma.vmem_to_hbm [thread:$0]  (%p1276_p12), %s1207_s9, 512, %s1212_s23, %s647_s6, %s960_s30, %s960_s30, %s956_s19  }
 0x1bc PF: > { %s676_s10 = sand.u32 1, %s932_s12   ;;  %p1277_p13 = scmp.ne.s32.totalorder %s1265_s25, 0 }
 0x1bd   : > { %p1278_p4 = scmp.ge.s32.totalorder %s944_s15, 2  ;;  %s677_s11 = scalar_lea.sflag [#allocation5], %s676_s10 }
 0x1bf   : > { %p799_p5 = pnand %p1278_p4, %p1277_p13 }
 0x1c1   : > { %p800_p7 = pneg %p799_p5 }
 0x1c3   : > { %927 = dma.done.wait (%p800_p7), %s677_s11, 512  }
 0x1c4   : > { %929 = vsyncadd (%p800_p7), %s677_s11, 4294966784  ;;  %p16_p8 = scmp.ge.s32.totalorder %s1006_s18, 4   ;;  %s1279_s12 = smov %s936_s13 }
 0x1c5   : > { %s1280_s13 = smov %s940_s14  ;;  %s1281_s14 = smov %s1018_s21 }
 0x1c6   : > { %s1282_s15 = smov %s1006_s18  ;;  %18 = sbr.rel (!%p16_p8) target bundleno = 5 (0x5), region = 78 }
 0x1cb   :  { %682 = vsyncpa [#allocation4], 1 }
 0x1cc   :  { %684 = vsyncpa [#allocation4 + $0x1], 1 }
 0x1cd   :  { %685 = vsyncpa [#allocation5], 1 }
 0x1ce   :  { %687 = vsyncpa [#allocation5 + $0x1], 1 }

</bundles_post_ra>
